<compile_context>
chip_gen: v7x
topology: tpu7x:2x2x1
jax: 0.10.0
libtpu: 0.0.40
codegen_flags: <defaults>
</compile_context>

<pallas_src>
import math

import jax
import jax.numpy as jnp
import numpy as np
from jax.experimental import pallas as pl
from jax.experimental.pallas import tpu as pltpu

LN_EPS = 1e-5


def _sdc_kernel(xc_ref, xt_ref, xb_ref, wk_ref, wsum_ref, b2_ref, o_ref):
    # xc_ref: (1, p, w,   p*C)  center rows of patch-row i (unpadded image)
    # xt_ref: (1, p, w+1, p*C)  padded-image rows  i*p    .. i*p+p-1   (lu / ru)
    # xb_ref: (1, p, w+1, p*C)  padded-image rows (i+1)*p .. (i+2)*p-1 (lb / rb)
    # wk_ref: (5, p, p*C, dim)  bf16 LN-folded weight, regrouped by (shift, p1)
    # wsum_ref, b2_ref: (1, dim)  colsum(W') and folded bias
    # o_ref:  (1, w, dim)
    p = xc_ref.shape[1]
    w = xc_ref.shape[2]
    pc = xc_ref.shape[3]
    dim = o_ref.shape[2]
    patch_dim = 5 * p * pc

    acc = jnp.zeros((w, dim), jnp.float32)
    s1 = jnp.zeros((w, 1), jnp.float32)
    s2 = jnp.zeros((w, 1), jnp.float32)

    def accum(chunk, g, p1, acc, s1, s2):
        # chunk: (w, p*C) f32 slice of one shift group at intra-patch row p1.
        wblk = wk_ref[g, p1]                                      # (p*C, dim) bf16
        acc = acc + jnp.dot(chunk.astype(wblk.dtype), wblk,
                            preferred_element_type=jnp.float32)
        s1 = s1 + jnp.sum(chunk, axis=-1, keepdims=True)
        s2 = s2 + jnp.sum(chunk * chunk, axis=-1, keepdims=True)
        return acc, s1, s2

    for p1 in range(p):                                           # static unroll (p is tiny)
        xc = xc_ref[0, p1].astype(jnp.float32)                    # (w,   p*C)
        xt = xt_ref[0, p1].astype(jnp.float32)                    # (w+1, p*C)
        xb = xb_ref[0, p1].astype(jnp.float32)                    # (w+1, p*C)
        acc, s1, s2 = accum(xc,              0, p1, acc, s1, s2)  # center
        acc, s1, s2 = accum(xt[0:w, :],      1, p1, acc, s1, s2)  # left-up
        acc, s1, s2 = accum(xt[1:w + 1, :],  2, p1, acc, s1, s2)  # right-up
        acc, s1, s2 = accum(xb[0:w, :],      3, p1, acc, s1, s2)  # left-bottom
        acc, s1, s2 = accum(xb[1:w + 1, :],  4, p1, acc, s1, s2)  # right-bottom

    inv_p = 1.0 / float(patch_dim)
    mean = s1 * inv_p
    var = s2 * inv_p - mean * mean                                # biased var (PyTorch LN)
    inv_std = jax.lax.rsqrt(var + LN_EPS)
    out = (acc - mean * wsum_ref[...]) * inv_std + b2_ref[...]
    o_ref[0] = out.astype(o_ref.dtype)


def spatial_displacement_contact(x, params, *, merging_size=2, is_pe=False):
    """Forward of SpatialDisplacementContact.

    x: (B, N, in_dim) with N = H*W (is_pe=False), or (B, in_dim, H, W) if is_pe.
    Returns (B, (H//p)*(W//p), dim).
    """
    gamma, beta, weight, bias = params
    p = merging_size
    assert p % 2 == 0, "merging_size must be even"
    s = p // 2

    if is_pe:
        B, C, H, W = x.shape
        x_nhwc = jnp.transpose(x, (0, 2, 3, 1))
    else:
        B, N, C = x.shape
        H = int(round(math.sqrt(N)))
        W = H
        # tokens are an (h, w) raster with channels last -> free reinterpretation
        x_nhwc = x.reshape(B, H, W, C)

    assert H % p == 0 and W % p == 0
    h, w = H // p, W // p
    pc = p * C
    patch_dim = p * p * 5 * C
    dim = weight.shape[1]

    # ---- trace-time parameter folding / row permutation (tiny, one-off) ----
    w_f32 = weight.astype(jnp.float32)
    w_eff = gamma.reshape(patch_dim, 1).astype(jnp.float32) * w_f32      # gamma folded in
    wsum = jnp.sum(w_eff, axis=0).reshape(1, dim)                        # for the -mean term
    b_eff = (beta.reshape(1, patch_dim).astype(jnp.float32) @ w_f32
             + bias.reshape(1, dim).astype(jnp.float32))                 # beta/bias folded
    # regroup rows from the module's (p1, p2, g*C + c) order to (g, p1, p2*C + c)
    wk = (w_eff.reshape(p, p, 5, C, dim)
               .transpose(2, 0, 1, 3, 4)
               .reshape(5, p, pc, dim)
               .astype(jnp.bfloat16))

    # ---- input views (the zero-pad is the only materialized copy) ----
    x_r = x_nhwc.reshape(B, H, w, pc)                                    # free view
    xp = jnp.pad(x_nhwc, ((0, 0), (s, s), (s, s), (0, 0)))
    xp_r = xp.reshape(B, H + p, w + 1, pc)                               # free view

    out = pl.pallas_call(
        _sdc_kernel,
        out_shape=jax.ShapeDtypeStruct((B, h * w, dim), jnp.float32),
        grid_spec=pltpu.PrefetchScalarGridSpec(
            num_scalar_prefetch=0,
            grid=(B, h),
            in_specs=[
                pl.BlockSpec((1, p, w, pc), lambda b, i: (b, i, 0, 0)),        # center rows
                pl.BlockSpec((1, p, w + 1, pc), lambda b, i: (b, i, 0, 0)),    # padded rows (top)
                pl.BlockSpec((1, p, w + 1, pc), lambda b, i: (b, i + 1, 0, 0)),  # padded rows (bottom)
                pl.BlockSpec((5, p, pc, dim), lambda b, i: (0, 0, 0, 0)),      # resident weight
                pl.BlockSpec((1, dim), lambda b, i: (0, 0)),
                pl.BlockSpec((1, dim), lambda b, i: (0, 0)),
            ],
            out_specs=pl.BlockSpec((1, w, dim), lambda b, i: (b, i, 0)),
        ),
        compiler_params=pltpu.CompilerParams(
            dimension_semantics=("parallel", "parallel")),
    )(x_r, xp_r, xp_r, wk, wsum, b_eff)
    # TODO(synk): for production dims, make `dim` a multiple of 128 (lane-dense stores).
    return out


# ----------------------------- pure-JAX reference -----------------------------
def displacement_contact(x_nchw, shift):
    """DisplacementContact.forward: pad + 4 diagonal shifts, concat on channels."""
    xp = jnp.pad(x_nchw, ((0, 0), (0, 0), (shift, shift), (shift, shift)))
    s2 = 2 * shift
    x_lu = xp[:, :, :-s2, :-s2]
    x_ru = xp[:, :, :-s2, s2:]
    x_lb = xp[:, :, s2:, :-s2]
    x_rb = xp[:, :, s2:, s2:]
    return jnp.concatenate([x_nchw, x_lu, x_ru, x_lb, x_rb], axis=1)


def _reference(x, params, merging_size=2):
    """Pure-JAX f32 reference following the original (concat + 6-D transpose) path."""
    gamma, beta, weight, bias = params
    B, N, D = x.shape
    H = int(round(math.sqrt(N)))
    out = jnp.transpose(x, (0, 2, 1)).reshape(B, D, H, H)
    x_cat = displacement_contact(out, merging_size // 2)
    C = 5 * D
    p = merging_size
    h = H // p
    xr = x_cat.reshape(B, C, h, p, h, p).transpose(0, 2, 4, 3, 5, 1)
    rows = xr.reshape(B * h * h, p * p * C).astype(jnp.float32)
    mean = rows.mean(-1, keepdims=True)
    var = ((rows - mean) ** 2).mean(-1, keepdims=True)
    y = (rows - mean) / jnp.sqrt(var + LN_EPS) * gamma + beta
    o = y @ weight + bias
    return o.reshape(B, h * h, weight.shape[1])


if __name__ == "__main__":
    # Small shapes: B=2, in_dim=4, H=W=16 -> N=256 tokens; merging_size=2; dim=32
    B, in_dim, H = 2, 4, 16
    merging_size, dim = 2, 32
    N = H * H
    patch_dim = in_dim * 5 * merging_size ** 2                  # 80

    key = jax.random.PRNGKey(0)
    kx, kg, kb, kw, kbias = jax.random.split(key, 5)
    x = jax.random.normal(kx, (B, N, in_dim), dtype=jnp.float32)

    # Deterministic synthetic parameters (LayerNorm affine + Linear).
    gamma = 1.0 + 0.1 * jax.random.normal(kg, (1, patch_dim), dtype=jnp.float32)
    beta = 0.1 * jax.random.normal(kb, (1, patch_dim), dtype=jnp.float32)
    weight = jax.random.normal(kw, (patch_dim, dim), dtype=jnp.float32) / math.sqrt(patch_dim)
    bias = 0.1 * jax.random.normal(kbias, (1, dim), dtype=jnp.float32)
    params = (gamma, beta, weight, bias)

    fwd = jax.jit(lambda xx, pp: spatial_displacement_contact(
        xx, pp, merging_size=merging_size))
    out = jax.block_until_ready(fwd(x, params))

    ref = jax.block_until_ready(_reference(x, params, merging_size=merging_size))
    assert out.shape == (B, (H // merging_size) ** 2, dim), out.shape
    # bf16 MXU operands -> tolerance loosened vs. the pure-f32 reference.
    np.testing.assert_allclose(np.asarray(out), np.asarray(ref), rtol=3e-2, atol=3e-2)

    print("KERNEL_OK")
</pallas_src>

<mosaic_0001>
module attributes {stable_mosaic.version = 11 : i64} {
  func.func @_sdc_kernel(%arg0: i32, %arg1: i32, %arg2: memref<1x2x8x8xf32, #tpu.memory_space<vmem>>, %arg3: memref<1x2x9x8xf32, #tpu.memory_space<vmem>>, %arg4: memref<1x2x9x8xf32, #tpu.memory_space<vmem>>, %arg5: memref<5x2x8x32xbf16, #tpu.memory_space<vmem>>, %arg6: memref<1x32xf32, #tpu.memory_space<vmem>>, %arg7: memref<1x32xf32, #tpu.memory_space<vmem>>, %arg8: memref<1x8x32xf32, #tpu.memory_space<vmem>>) attributes {dimension_semantics = [#tpu.dimension_semantics<parallel>, #tpu.dimension_semantics<parallel>], iteration_bounds = array<i64: 2, 8>, scalar_prefetch = 0 : i64, scratch_operands = 0 : i64, tpu.core_type = #tpu.core_type<tc>, window_params = [{transform_indices = @transform_0, window_bounds = array<i64: 1, 2, 8, 8>}, {transform_indices = @transform_1, window_bounds = array<i64: 1, 2, 9, 8>}, {transform_indices = @transform_2, window_bounds = array<i64: 1, 2, 9, 8>}, {pipeline_mode = #tpu.pipeline_mode<synchronous>, transform_indices = @transform_3, window_bounds = array<i64: 5, 2, 8, 32>}, {pipeline_mode = #tpu.pipeline_mode<synchronous>, transform_indices = @transform_4, window_bounds = array<i64: 1, 32>}, {pipeline_mode = #tpu.pipeline_mode<synchronous>, transform_indices = @transform_5, window_bounds = array<i64: 1, 32>}, {transform_indices = @transform_6, window_bounds = array<i64: 1, 8, 32>}]} {
    %cst = arith.constant 0.000000e+00 : f32
    %0 = vector.broadcast %cst : f32 to vector<8x32xf32>
    %cst_0 = arith.constant 0.000000e+00 : f32
    %1 = vector.broadcast %cst_0 : f32 to vector<8x1xf32>
    %cst_1 = arith.constant 0.000000e+00 : f32
    %2 = vector.broadcast %cst_1 : f32 to vector<8x1xf32>
    %c0 = arith.constant 0 : index
    %c0_2 = arith.constant 0 : index
    %c0_3 = arith.constant 0 : index
    %c0_4 = arith.constant 0 : index
    %3 = vector.load %arg2[%c0, %c0_2, %c0_3, %c0_4] : memref<1x2x8x8xf32, #tpu.memory_space<vmem>>, vector<1x1x8x8xf32>
    %4 = vector.shape_cast %3 : vector<1x1x8x8xf32> to vector<8x8xf32>
    %c0_5 = arith.constant 0 : index
    %c0_6 = arith.constant 0 : index
    %c0_7 = arith.constant 0 : index
    %c0_8 = arith.constant 0 : index
    %5 = vector.load %arg3[%c0_5, %c0_6, %c0_7, %c0_8] : memref<1x2x9x8xf32, #tpu.memory_space<vmem>>, vector<1x1x9x8xf32>
    %6 = vector.shape_cast %5 : vector<1x1x9x8xf32> to vector<9x8xf32>
    %c0_9 = arith.constant 0 : index
    %c0_10 = arith.constant 0 : index
    %c0_11 = arith.constant 0 : index
    %c0_12 = arith.constant 0 : index
    %7 = vector.load %arg4[%c0_9, %c0_10, %c0_11, %c0_12] : memref<1x2x9x8xf32, #tpu.memory_space<vmem>>, vector<1x1x9x8xf32>
    %8 = vector.shape_cast %7 : vector<1x1x9x8xf32> to vector<9x8xf32>
    %c0_13 = arith.constant 0 : index
    %c0_14 = arith.constant 0 : index
    %c0_15 = arith.constant 0 : index
    %c0_16 = arith.constant 0 : index
    %9 = vector.load %arg5[%c0_13, %c0_14, %c0_15, %c0_16] : memref<5x2x8x32xbf16, #tpu.memory_space<vmem>>, vector<1x1x8x32xbf16>
    %10 = vector.shape_cast %9 : vector<1x1x8x32xbf16> to vector<8x32xbf16>
    %11 = arith.truncf %4 : vector<8x8xf32> to vector<8x8xbf16>
    %cst_17 = arith.constant dense<0.000000e+00> : vector<8x32xf32>
    %12 = tpu.matmul %11, %10, %cst_17 {dimension_numbers = #tpu.dot_dimension_numbers<[1], [0], [0], [1], [0, 0, 1, 1], [], []>} : vector<8x8xbf16>, vector<8x32xbf16>, vector<8x32xf32> -> vector<8x32xf32>
    %13 = arith.addf %0, %12 : vector<8x32xf32>
    %cst_18 = arith.constant dense<0.000000e+00> : vector<8xf32>
    %14 = vector.multi_reduction <add>, %4, %cst_18 [1] : vector<8x8xf32> to vector<8xf32>
    %15 = vector.shape_cast %14 : vector<8xf32> to vector<8x1xf32>
    %16 = arith.addf %1, %15 : vector<8x1xf32>
    %17 = arith.mulf %4, %4 : vector<8x8xf32>
    %cst_19 = arith.constant dense<0.000000e+00> : vector<8xf32>
    %18 = vector.multi_reduction <add>, %17, %cst_19 [1] : vector<8x8xf32> to vector<8xf32>
    %19 = vector.shape_cast %18 : vector<8xf32> to vector<8x1xf32>
    %20 = arith.addf %2, %19 : vector<8x1xf32>
    %21 = vector.extract_strided_slice %6 {offsets = [0, 0], sizes = [8, 8], strides = [1, 1]} : vector<9x8xf32> to vector<8x8xf32>
    %c1 = arith.constant 1 : index
    %c0_20 = arith.constant 0 : index
    %c0_21 = arith.constant 0 : index
    %c0_22 = arith.constant 0 : index
    %22 = vector.load %arg5[%c1, %c0_20, %c0_21, %c0_22] : memref<5x2x8x32xbf16, #tpu.memory_space<vmem>>, vector<1x1x8x32xbf16>
    %23 = vector.shape_cast %22 : vector<1x1x8x32xbf16> to vector<8x32xbf16>
    %24 = arith.truncf %21 : vector<8x8xf32> to vector<8x8xbf16>
    %cst_23 = arith.constant dense<0.000000e+00> : vector<8x32xf32>
    %25 = tpu.matmul %24, %23, %cst_23 {dimension_numbers = #tpu.dot_dimension_numbers<[1], [0], [0], [1], [0, 0, 1, 1], [], []>} : vector<8x8xbf16>, vector<8x32xbf16>, vector<8x32xf32> -> vector<8x32xf32>
    %26 = arith.addf %13, %25 : vector<8x32xf32>
    %cst_24 = arith.constant dense<0.000000e+00> : vector<8xf32>
    %27 = vector.multi_reduction <add>, %21, %cst_24 [1] : vector<8x8xf32> to vector<8xf32>
    %28 = vector.shape_cast %27 : vector<8xf32> to vector<8x1xf32>
    %29 = arith.addf %16, %28 : vector<8x1xf32>
    %30 = arith.mulf %21, %21 : vector<8x8xf32>
    %cst_25 = arith.constant dense<0.000000e+00> : vector<8xf32>
    %31 = vector.multi_reduction <add>, %30, %cst_25 [1] : vector<8x8xf32> to vector<8xf32>
    %32 = vector.shape_cast %31 : vector<8xf32> to vector<8x1xf32>
    %33 = arith.addf %20, %32 : vector<8x1xf32>
    %34 = vector.extract_strided_slice %6 {offsets = [1, 0], sizes = [8, 8], strides = [1, 1]} : vector<9x8xf32> to vector<8x8xf32>
    %c2 = arith.constant 2 : index
    %c0_26 = arith.constant 0 : index
    %c0_27 = arith.constant 0 : index
    %c0_28 = arith.constant 0 : index
    %35 = vector.load %arg5[%c2, %c0_26, %c0_27, %c0_28] : memref<5x2x8x32xbf16, #tpu.memory_space<vmem>>, vector<1x1x8x32xbf16>
    %36 = vector.shape_cast %35 : vector<1x1x8x32xbf16> to vector<8x32xbf16>
    %37 = arith.truncf %34 : vector<8x8xf32> to vector<8x8xbf16>
    %cst_29 = arith.constant dense<0.000000e+00> : vector<8x32xf32>
    %38 = tpu.matmul %37, %36, %cst_29 {dimension_numbers = #tpu.dot_dimension_numbers<[1], [0], [0], [1], [0, 0, 1, 1], [], []>} : vector<8x8xbf16>, vector<8x32xbf16>, vector<8x32xf32> -> vector<8x32xf32>
    %39 = arith.addf %26, %38 : vector<8x32xf32>
    %cst_30 = arith.constant dense<0.000000e+00> : vector<8xf32>
    %40 = vector.multi_reduction <add>, %34, %cst_30 [1] : vector<8x8xf32> to vector<8xf32>
    %41 = vector.shape_cast %40 : vector<8xf32> to vector<8x1xf32>
    %42 = arith.addf %29, %41 : vector<8x1xf32>
    %43 = arith.mulf %34, %34 : vector<8x8xf32>
    %cst_31 = arith.constant dense<0.000000e+00> : vector<8xf32>
    %44 = vector.multi_reduction <add>, %43, %cst_31 [1] : vector<8x8xf32> to vector<8xf32>
    %45 = vector.shape_cast %44 : vector<8xf32> to vector<8x1xf32>
    %46 = arith.addf %33, %45 : vector<8x1xf32>
    %47 = vector.extract_strided_slice %8 {offsets = [0, 0], sizes = [8, 8], strides = [1, 1]} : vector<9x8xf32> to vector<8x8xf32>
    %c3 = arith.constant 3 : index
    %c0_32 = arith.constant 0 : index
    %c0_33 = arith.constant 0 : index
    %c0_34 = arith.constant 0 : index
    %48 = vector.load %arg5[%c3, %c0_32, %c0_33, %c0_34] : memref<5x2x8x32xbf16, #tpu.memory_space<vmem>>, vector<1x1x8x32xbf16>
    %49 = vector.shape_cast %48 : vector<1x1x8x32xbf16> to vector<8x32xbf16>
    %50 = arith.truncf %47 : vector<8x8xf32> to vector<8x8xbf16>
    %cst_35 = arith.constant dense<0.000000e+00> : vector<8x32xf32>
    %51 = tpu.matmul %50, %49, %cst_35 {dimension_numbers = #tpu.dot_dimension_numbers<[1], [0], [0], [1], [0, 0, 1, 1], [], []>} : vector<8x8xbf16>, vector<8x32xbf16>, vector<8x32xf32> -> vector<8x32xf32>
    %52 = arith.addf %39, %51 : vector<8x32xf32>
    %cst_36 = arith.constant dense<0.000000e+00> : vector<8xf32>
    %53 = vector.multi_reduction <add>, %47, %cst_36 [1] : vector<8x8xf32> to vector<8xf32>
    %54 = vector.shape_cast %53 : vector<8xf32> to vector<8x1xf32>
    %55 = arith.addf %42, %54 : vector<8x1xf32>
    %56 = arith.mulf %47, %47 : vector<8x8xf32>
    %cst_37 = arith.constant dense<0.000000e+00> : vector<8xf32>
    %57 = vector.multi_reduction <add>, %56, %cst_37 [1] : vector<8x8xf32> to vector<8xf32>
    %58 = vector.shape_cast %57 : vector<8xf32> to vector<8x1xf32>
    %59 = arith.addf %46, %58 : vector<8x1xf32>
    %60 = vector.extract_strided_slice %8 {offsets = [1, 0], sizes = [8, 8], strides = [1, 1]} : vector<9x8xf32> to vector<8x8xf32>
    %c4 = arith.constant 4 : index
    %c0_38 = arith.constant 0 : index
    %c0_39 = arith.constant 0 : index
    %c0_40 = arith.constant 0 : index
    %61 = vector.load %arg5[%c4, %c0_38, %c0_39, %c0_40] : memref<5x2x8x32xbf16, #tpu.memory_space<vmem>>, vector<1x1x8x32xbf16>
    %62 = vector.shape_cast %61 : vector<1x1x8x32xbf16> to vector<8x32xbf16>
    %63 = arith.truncf %60 : vector<8x8xf32> to vector<8x8xbf16>
    %cst_41 = arith.constant dense<0.000000e+00> : vector<8x32xf32>
    %64 = tpu.matmul %63, %62, %cst_41 {dimension_numbers = #tpu.dot_dimension_numbers<[1], [0], [0], [1], [0, 0, 1, 1], [], []>} : vector<8x8xbf16>, vector<8x32xbf16>, vector<8x32xf32> -> vector<8x32xf32>
    %65 = arith.addf %52, %64 : vector<8x32xf32>
    %cst_42 = arith.constant dense<0.000000e+00> : vector<8xf32>
    %66 = vector.multi_reduction <add>, %60, %cst_42 [1] : vector<8x8xf32> to vector<8xf32>
    %67 = vector.shape_cast %66 : vector<8xf32> to vector<8x1xf32>
    %68 = arith.addf %55, %67 : vector<8x1xf32>
    %69 = arith.mulf %60, %60 : vector<8x8xf32>
    %cst_43 = arith.constant dense<0.000000e+00> : vector<8xf32>
    %70 = vector.multi_reduction <add>, %69, %cst_43 [1] : vector<8x8xf32> to vector<8xf32>
    %71 = vector.shape_cast %70 : vector<8xf32> to vector<8x1xf32>
    %72 = arith.addf %59, %71 : vector<8x1xf32>
    %c0_44 = arith.constant 0 : index
    %c1_45 = arith.constant 1 : index
    %c0_46 = arith.constant 0 : index
    %c0_47 = arith.constant 0 : index
    %73 = vector.load %arg2[%c0_44, %c1_45, %c0_46, %c0_47] : memref<1x2x8x8xf32, #tpu.memory_space<vmem>>, vector<1x1x8x8xf32>
    %74 = vector.shape_cast %73 : vector<1x1x8x8xf32> to vector<8x8xf32>
    %c0_48 = arith.constant 0 : index
    %c1_49 = arith.constant 1 : index
    %c0_50 = arith.constant 0 : index
    %c0_51 = arith.constant 0 : index
    %75 = vector.load %arg3[%c0_48, %c1_49, %c0_50, %c0_51] : memref<1x2x9x8xf32, #tpu.memory_space<vmem>>, vector<1x1x9x8xf32>
    %76 = vector.shape_cast %75 : vector<1x1x9x8xf32> to vector<9x8xf32>
    %c0_52 = arith.constant 0 : index
    %c1_53 = arith.constant 1 : index
    %c0_54 = arith.constant 0 : index
    %c0_55 = arith.constant 0 : index
    %77 = vector.load %arg4[%c0_52, %c1_53, %c0_54, %c0_55] : memref<1x2x9x8xf32, #tpu.memory_space<vmem>>, vector<1x1x9x8xf32>
    %78 = vector.shape_cast %77 : vector<1x1x9x8xf32> to vector<9x8xf32>
    %c0_56 = arith.constant 0 : index
    %c1_57 = arith.constant 1 : index
    %c0_58 = arith.constant 0 : index
    %c0_59 = arith.constant 0 : index
    %79 = vector.load %arg5[%c0_56, %c1_57, %c0_58, %c0_59] : memref<5x2x8x32xbf16, #tpu.memory_space<vmem>>, vector<1x1x8x32xbf16>
    %80 = vector.shape_cast %79 : vector<1x1x8x32xbf16> to vector<8x32xbf16>
    %81 = arith.truncf %74 : vector<8x8xf32> to vector<8x8xbf16>
    %cst_60 = arith.constant dense<0.000000e+00> : vector<8x32xf32>
    %82 = tpu.matmul %81, %80, %cst_60 {dimension_numbers = #tpu.dot_dimension_numbers<[1], [0], [0], [1], [0, 0, 1, 1], [], []>} : vector<8x8xbf16>, vector<8x32xbf16>, vector<8x32xf32> -> vector<8x32xf32>
    %83 = arith.addf %65, %82 : vector<8x32xf32>
    %cst_61 = arith.constant dense<0.000000e+00> : vector<8xf32>
    %84 = vector.multi_reduction <add>, %74, %cst_61 [1] : vector<8x8xf32> to vector<8xf32>
    %85 = vector.shape_cast %84 : vector<8xf32> to vector<8x1xf32>
    %86 = arith.addf %68, %85 : vector<8x1xf32>
    %87 = arith.mulf %74, %74 : vector<8x8xf32>
    %cst_62 = arith.constant dense<0.000000e+00> : vector<8xf32>
    %88 = vector.multi_reduction <add>, %87, %cst_62 [1] : vector<8x8xf32> to vector<8xf32>
    %89 = vector.shape_cast %88 : vector<8xf32> to vector<8x1xf32>
    %90 = arith.addf %72, %89 : vector<8x1xf32>
    %91 = vector.extract_strided_slice %76 {offsets = [0, 0], sizes = [8, 8], strides = [1, 1]} : vector<9x8xf32> to vector<8x8xf32>
    %c1_63 = arith.constant 1 : index
    %c1_64 = arith.constant 1 : index
    %c0_65 = arith.constant 0 : index
    %c0_66 = arith.constant 0 : index
    %92 = vector.load %arg5[%c1_63, %c1_64, %c0_65, %c0_66] : memref<5x2x8x32xbf16, #tpu.memory_space<vmem>>, vector<1x1x8x32xbf16>
    %93 = vector.shape_cast %92 : vector<1x1x8x32xbf16> to vector<8x32xbf16>
    %94 = arith.truncf %91 : vector<8x8xf32> to vector<8x8xbf16>
    %cst_67 = arith.constant dense<0.000000e+00> : vector<8x32xf32>
    %95 = tpu.matmul %94, %93, %cst_67 {dimension_numbers = #tpu.dot_dimension_numbers<[1], [0], [0], [1], [0, 0, 1, 1], [], []>} : vector<8x8xbf16>, vector<8x32xbf16>, vector<8x32xf32> -> vector<8x32xf32>
    %96 = arith.addf %83, %95 : vector<8x32xf32>
    %cst_68 = arith.constant dense<0.000000e+00> : vector<8xf32>
    %97 = vector.multi_reduction <add>, %91, %cst_68 [1] : vector<8x8xf32> to vector<8xf32>
    %98 = vector.shape_cast %97 : vector<8xf32> to vector<8x1xf32>
    %99 = arith.addf %86, %98 : vector<8x1xf32>
    %100 = arith.mulf %91, %91 : vector<8x8xf32>
    %cst_69 = arith.constant dense<0.000000e+00> : vector<8xf32>
    %101 = vector.multi_reduction <add>, %100, %cst_69 [1] : vector<8x8xf32> to vector<8xf32>
    %102 = vector.shape_cast %101 : vector<8xf32> to vector<8x1xf32>
    %103 = arith.addf %90, %102 : vector<8x1xf32>
    %104 = vector.extract_strided_slice %76 {offsets = [1, 0], sizes = [8, 8], strides = [1, 1]} : vector<9x8xf32> to vector<8x8xf32>
    %c2_70 = arith.constant 2 : index
    %c1_71 = arith.constant 1 : index
    %c0_72 = arith.constant 0 : index
    %c0_73 = arith.constant 0 : index
    %105 = vector.load %arg5[%c2_70, %c1_71, %c0_72, %c0_73] : memref<5x2x8x32xbf16, #tpu.memory_space<vmem>>, vector<1x1x8x32xbf16>
    %106 = vector.shape_cast %105 : vector<1x1x8x32xbf16> to vector<8x32xbf16>
    %107 = arith.truncf %104 : vector<8x8xf32> to vector<8x8xbf16>
    %cst_74 = arith.constant dense<0.000000e+00> : vector<8x32xf32>
    %108 = tpu.matmul %107, %106, %cst_74 {dimension_numbers = #tpu.dot_dimension_numbers<[1], [0], [0], [1], [0, 0, 1, 1], [], []>} : vector<8x8xbf16>, vector<8x32xbf16>, vector<8x32xf32> -> vector<8x32xf32>
    %109 = arith.addf %96, %108 : vector<8x32xf32>
    %cst_75 = arith.constant dense<0.000000e+00> : vector<8xf32>
    %110 = vector.multi_reduction <add>, %104, %cst_75 [1] : vector<8x8xf32> to vector<8xf32>
    %111 = vector.shape_cast %110 : vector<8xf32> to vector<8x1xf32>
    %112 = arith.addf %99, %111 : vector<8x1xf32>
    %113 = arith.mulf %104, %104 : vector<8x8xf32>
    %cst_76 = arith.constant dense<0.000000e+00> : vector<8xf32>
    %114 = vector.multi_reduction <add>, %113, %cst_76 [1] : vector<8x8xf32> to vector<8xf32>
    %115 = vector.shape_cast %114 : vector<8xf32> to vector<8x1xf32>
    %116 = arith.addf %103, %115 : vector<8x1xf32>
    %117 = vector.extract_strided_slice %78 {offsets = [0, 0], sizes = [8, 8], strides = [1, 1]} : vector<9x8xf32> to vector<8x8xf32>
    %c3_77 = arith.constant 3 : index
    %c1_78 = arith.constant 1 : index
    %c0_79 = arith.constant 0 : index
    %c0_80 = arith.constant 0 : index
    %118 = vector.load %arg5[%c3_77, %c1_78, %c0_79, %c0_80] : memref<5x2x8x32xbf16, #tpu.memory_space<vmem>>, vector<1x1x8x32xbf16>
    %119 = vector.shape_cast %118 : vector<1x1x8x32xbf16> to vector<8x32xbf16>
    %120 = arith.truncf %117 : vector<8x8xf32> to vector<8x8xbf16>
    %cst_81 = arith.constant dense<0.000000e+00> : vector<8x32xf32>
    %121 = tpu.matmul %120, %119, %cst_81 {dimension_numbers = #tpu.dot_dimension_numbers<[1], [0], [0], [1], [0, 0, 1, 1], [], []>} : vector<8x8xbf16>, vector<8x32xbf16>, vector<8x32xf32> -> vector<8x32xf32>
    %122 = arith.addf %109, %121 : vector<8x32xf32>
    %cst_82 = arith.constant dense<0.000000e+00> : vector<8xf32>
    %123 = vector.multi_reduction <add>, %117, %cst_82 [1] : vector<8x8xf32> to vector<8xf32>
    %124 = vector.shape_cast %123 : vector<8xf32> to vector<8x1xf32>
    %125 = arith.addf %112, %124 : vector<8x1xf32>
    %126 = arith.mulf %117, %117 : vector<8x8xf32>
    %cst_83 = arith.constant dense<0.000000e+00> : vector<8xf32>
    %127 = vector.multi_reduction <add>, %126, %cst_83 [1] : vector<8x8xf32> to vector<8xf32>
    %128 = vector.shape_cast %127 : vector<8xf32> to vector<8x1xf32>
    %129 = arith.addf %116, %128 : vector<8x1xf32>
    %130 = vector.extract_strided_slice %78 {offsets = [1, 0], sizes = [8, 8], strides = [1, 1]} : vector<9x8xf32> to vector<8x8xf32>
    %c4_84 = arith.constant 4 : index
    %c1_85 = arith.constant 1 : index
    %c0_86 = arith.constant 0 : index
    %c0_87 = arith.constant 0 : index
    %131 = vector.load %arg5[%c4_84, %c1_85, %c0_86, %c0_87] : memref<5x2x8x32xbf16, #tpu.memory_space<vmem>>, vector<1x1x8x32xbf16>
    %132 = vector.shape_cast %131 : vector<1x1x8x32xbf16> to vector<8x32xbf16>
    %133 = arith.truncf %130 : vector<8x8xf32> to vector<8x8xbf16>
    %cst_88 = arith.constant dense<0.000000e+00> : vector<8x32xf32>
    %134 = tpu.matmul %133, %132, %cst_88 {dimension_numbers = #tpu.dot_dimension_numbers<[1], [0], [0], [1], [0, 0, 1, 1], [], []>} : vector<8x8xbf16>, vector<8x32xbf16>, vector<8x32xf32> -> vector<8x32xf32>
    %135 = arith.addf %122, %134 : vector<8x32xf32>
    %cst_89 = arith.constant dense<0.000000e+00> : vector<8xf32>
    %136 = vector.multi_reduction <add>, %130, %cst_89 [1] : vector<8x8xf32> to vector<8xf32>
    %137 = vector.shape_cast %136 : vector<8xf32> to vector<8x1xf32>
    %138 = arith.addf %125, %137 : vector<8x1xf32>
    %139 = arith.mulf %130, %130 : vector<8x8xf32>
    %cst_90 = arith.constant dense<0.000000e+00> : vector<8xf32>
    %140 = vector.multi_reduction <add>, %139, %cst_90 [1] : vector<8x8xf32> to vector<8xf32>
    %141 = vector.shape_cast %140 : vector<8xf32> to vector<8x1xf32>
    %142 = arith.addf %129, %141 : vector<8x1xf32>
    %cst_91 = arith.constant 1.250000e-02 : f32
    %143 = vector.broadcast %cst_91 : f32 to vector<8x1xf32>
    %144 = arith.mulf %138, %143 : vector<8x1xf32>
    %cst_92 = arith.constant 1.250000e-02 : f32
    %145 = vector.broadcast %cst_92 : f32 to vector<8x1xf32>
    %146 = arith.mulf %142, %145 : vector<8x1xf32>
    %147 = arith.mulf %144, %144 : vector<8x1xf32>
    %148 = arith.subf %146, %147 : vector<8x1xf32>
    %cst_93 = arith.constant 9.99999974E-6 : f32
    %149 = vector.broadcast %cst_93 : f32 to vector<8x1xf32>
    %150 = arith.addf %148, %149 : vector<8x1xf32>
    %151 = math.rsqrt %150 : vector<8x1xf32>
    %c0_94 = arith.constant 0 : index
    %c0_95 = arith.constant 0 : index
    %152 = vector.load %arg6[%c0_94, %c0_95] : memref<1x32xf32, #tpu.memory_space<vmem>>, vector<1x32xf32>
    %153 = vector.broadcast %144 : vector<8x1xf32> to vector<8x32xf32>
    %154 = vector.broadcast %152 : vector<1x32xf32> to vector<8x32xf32>
    %155 = arith.mulf %153, %154 : vector<8x32xf32>
    %156 = arith.subf %135, %155 : vector<8x32xf32>
    %157 = vector.broadcast %151 : vector<8x1xf32> to vector<8x32xf32>
    %158 = arith.mulf %156, %157 : vector<8x32xf32>
    %c0_96 = arith.constant 0 : index
    %c0_97 = arith.constant 0 : index
    %159 = vector.load %arg7[%c0_96, %c0_97] : memref<1x32xf32, #tpu.memory_space<vmem>>, vector<1x32xf32>
    %160 = vector.broadcast %159 : vector<1x32xf32> to vector<8x32xf32>
    %161 = arith.addf %158, %160 : vector<8x32xf32>
    %c0_98 = arith.constant 0 : index
    %c0_99 = arith.constant 0 : index
    %c0_100 = arith.constant 0 : index
    %162 = vector.load %arg8[%c0_98, %c0_99, %c0_100] : memref<1x8x32xf32, #tpu.memory_space<vmem>>, vector<1x8x32xf32>
    %163 = vector.shape_cast %162 : vector<1x8x32xf32> to vector<8x32xf32>
    %164 = vector.shape_cast %161 : vector<8x32xf32> to vector<1x8x32xf32>
    tpu.vector_store %arg8[%c0_98, %c0_99, %c0_100], %164 {strides = array<i32>} : memref<1x8x32xf32, #tpu.memory_space<vmem>>, vector<1x8x32xf32>,
    return
  }
  func.func @transform_0(%arg0: i32, %arg1: i32) -> (i32, i32, i32, i32) {
    %c0_i32 = arith.constant 0 : i32
    %c0_i32_0 = arith.constant 0 : i32
    %c0_i32_1 = arith.constant 0 : i32
    return %arg0, %arg1, %c0_i32, %c0_i32_0 : i32, i32, i32, i32
  }
  func.func @transform_1(%arg0: i32, %arg1: i32) -> (i32, i32, i32, i32) {
    %c0_i32 = arith.constant 0 : i32
    %c0_i32_0 = arith.constant 0 : i32
    %c0_i32_1 = arith.constant 0 : i32
    return %arg0, %arg1, %c0_i32, %c0_i32_0 : i32, i32, i32, i32
  }
  func.func @transform_2(%arg0: i32, %arg1: i32) -> (i32, i32, i32, i32) {
    %c1_i32 = arith.constant 1 : i32
    %0 = arith.addi %arg1, %c1_i32 : i32
    %c0_i32 = arith.constant 0 : i32
    %c0_i32_0 = arith.constant 0 : i32
    %c0_i32_1 = arith.constant 0 : i32
    return %arg0, %0, %c0_i32, %c0_i32_0 : i32, i32, i32, i32
  }
  func.func @transform_3(%arg0: i32, %arg1: i32) -> (i32, i32, i32, i32) {
    %c0_i32 = arith.constant 0 : i32
    %c0_i32_0 = arith.constant 0 : i32
    %c0_i32_1 = arith.constant 0 : i32
    %c0_i32_2 = arith.constant 0 : i32
    %c0_i32_3 = arith.constant 0 : i32
    return %c0_i32, %c0_i32_0, %c0_i32_1, %c0_i32_2 : i32, i32, i32, i32
  }
  func.func @transform_4(%arg0: i32, %arg1: i32) -> (i32, i32) {
    %c0_i32 = arith.constant 0 : i32
    %c0_i32_0 = arith.constant 0 : i32
    %c0_i32_1 = arith.constant 0 : i32
    return %c0_i32, %c0_i32_0 : i32, i32
  }
  func.func @transform_5(%arg0: i32, %arg1: i32) -> (i32, i32) {
    %c0_i32 = arith.constant 0 : i32
    %c0_i32_0 = arith.constant 0 : i32
    %c0_i32_1 = arith.constant 0 : i32
    return %c0_i32, %c0_i32_0 : i32, i32
  }
  func.func @transform_6(%arg0: i32, %arg1: i32) -> (i32, i32, i32) {
    %c0_i32 = arith.constant 0 : i32
    %c0_i32_0 = arith.constant 0 : i32
    return %arg0, %arg1, %c0_i32 : i32, i32, i32
  }
}

</mosaic_0001>

<bundles_post_ra>
// kernel: _lambda_.1
= control target key start
LH: loop header
LB: loop body
LE: loop exit
PB: predicated region body
PF: predicated region fallthrough
CT: control target
= control target key end

     0   :  { %s1528_s21 = smov 0   ;;  %s1530_s22 = smov 0   ;;  %s1774_s0 = inlined_call_operand.vmem [shape: f32[2,16,8,8], index: 0, kind: input, shape index: {}]   ;;  %s1775_s1 = inlined_call_operand.vmem [shape: f32[2,18,9,8], index: 1, kind: input, shape index: {}, may-alias: {1,2}]   ;;  %s1776_s2 = inlined_call_operand.vmem [shape: f32[2,18,9,8], index: 2, kind: input, shape index: {}, may-alias: {1,2}]   ;;  %s1777_s3 = inlined_call_operand.vmem [shape: bf16[5,2,8,32], index: 3, kind: input, shape index: {}]   ;;  %s1778_s4 = inlined_call_operand.vmem [shape: f32[1,32], index: 4, kind: input, shape index: {}]   ;;  %s1779_s5 = inlined_call_operand.vmem [shape: f32[1,32], index: 5, kind: input, shape index: {}]   ;;  %s1780_s6 = inlined_call_operand.vmem [shape: f32[2,64,32], index: 6, kind: output, shape index: {}]  }
   0x1   :  { %s1532_s23 = smov 0   ;;  %s1534_s24 = smov 0  }
   0x2   :  { %s1536_s25 = smov 0  }
   0x3 LB: > { %s25_s26 = sadd.s32 1, %s1480_s23  ;;  %s28_s27 = sadd.s32 1, %s1484_s24  ;;  %s1488_s25 = sphi %s1536_s25, %s16_s25   ;;  %s1484_s24 = sphi %s1534_s24, %s1784_s24   ;;  %s1480_s23 = sphi %s1532_s23, %s1783_s23   ;;  %s1476_s22 = sphi %s1530_s22, %s1782_s22   ;;  %s1472_s21 = sphi %s1528_s21, %s1781_s21  }
   0x4   : > { %p26_p0 = scmp.ge.s32.totalorder %s25_s26, 8  ;;  %p1247_p1 = scmp.ge.s32.totalorder %s1488_s25, 1 }
   0x5   : > { %p273_p2 = scmp.lt.s32.totalorder %s1488_s25, 17 }
   0x6   : > { %s1786_s26 = smov (%p26_p0, %s25_s26), 0  ;;  %s1788_s27 = smov (!%p26_p0, %s28_s27), %s1484_s24 }
   0x7   : > { %p274_p3 = pnand %p1247_p1, %p273_p2  ;;  %p30_p4 = scmp.ge.s32.totalorder %s1788_s27, 2 }
   0x8   : > { %s1561_s28 = sshll.u32 (!%p274_p3), %s1472_s21, 1  ;;  %p332_p5 = scmp.lt.s32.totalorder (!%p274_p3), %s1476_s22, 1  ;;  %v1490_v0 = vmov (!%p274_p3), 0.0   ;;  %v1259_v1 = vld [vmem:[%s1777_s3 + $0x8] sm:$0xf] (!%p274_p3)  ;;  %vm397_vm0 = vcmask (!%p274_p3), 1043456  }
   0x9   : > { %s1790_s27 = smov (%p30_p4, %s1788_s27), 0  ;;  %277 = sbr.rel (%p274_p3) target bundleno = 376 (0x178), region = 44 }
   0xa   : > { %p334_p6 = scmp.lt.s32.totalorder (!%p274_p3), %s1561_s28, 15  ;;  %1309 = vmatprep.subr.bf16.mxu1 (!%p274_p3), %v1490_v0  ;;  %1339 = vmatprep.subr.bf16.mxu0 (!%p274_p3), %v1490_v0  ;;  %v399_v2 = vsel (!%p274_p3), %vm397_vm0, %v1259_v1, 0  ;;  %v1273_v3 = vld [vmem:[%s1777_s3 + $0x4] sm:$0xf] (!%p274_p3)  ;;  %vm1491_vm1 = vmmov (!%p274_p3), 0   ;;  %p344_p7 = scmp.lt.s32.totalorder (!%p274_p3), %s1561_s28, 17 }
   0xb   : > { %1311 = vmatprep.mubr.msk.bf16.mxu1 (!%p274_p3), %vm1491_vm1, %v1490_v0  ;;  %1341 = vmatprep.mubr.msk.bf16.mxu0 (!%p274_p3), %vm1491_vm1, %v1490_v0  ;;  %v741_v4 = vsel (!%p274_p3), %vm397_vm0, %v1273_v3, 0  ;;  %s1288_s12 = sadd.s32 (!%p274_p3), 2, %s1561_s28  ;;  %vm381_vm2 = vcmask (!%p274_p3), 64512   ;;  %v1275_v5 = vld [vmem:[%s1777_s3 + $0xc] sm:$0xf] (!%p274_p3)  ;;  %vm553_vm3 = vcmask (!%p274_p3), 64513  }
   0xc   : > { %1310 = vmatpush3.bf16.msra.mxu1 (!%p274_p3), %v399_v2  ;;  %1340 = vmatpush3.bf16.msra.mxu0 (!%p274_p3), %v741_v4  ;;  %p356_p8 = scmp.lt.s32.totalorder (!%p274_p3), %s1288_s12, 17  ;;  %v800_v10 = vsel (!%p274_p3), %vm397_vm0, %v1275_v5, 0  ;;  %vm557_vm4 = vcmask (!%p274_p3), 57344   ;;  %v379_v19 = vld [vmem:[%s1777_s3] sm:$0xf] (!%p274_p3)  ;;  %vm563_vm5 = vcmask (!%p274_p3), 1046528  }
   0xd   : > { %1315 = vmatprep.subr.bf16.mxu1 (!%p274_p3), %v1490_v0  ;;  %1345 = vmatprep.subr.bf16.mxu0 (!%p274_p3), %v1490_v0  ;;  %v445_v24 = vsel (!%p274_p3), %vm397_vm0, %v379_v19, 0  ;;  %v1277_v25 = vld [vmem:[%s1777_s3 + $0x14] sm:$0xf] (!%p274_p3)  ;;  %v1262_v41 = vld [vmem:[%s1777_s3 + $0x10] sm:$0xf] (!%p274_p3)  ;;  %p367_p9 = scmp.lt.s32.totalorder (!%p274_p3), %s1472_s21, 7 }
   0xe   : > { %v866_v32 = vsel (!%p274_p3), %vm397_vm0, %v1277_v25, 0  ;;  %v510_v44 = vsel (!%p274_p3), %vm397_vm0, %v1262_v41, 0  ;;  %v1279_v45 = vld [vmem:[%s1777_s3 + $0x1c] sm:$0xf] (!%p274_p3)  ;;  %v1264_v60 = vld [vmem:[%s1777_s3 + $0x18] sm:$0xf] (!%p274_p3) }
   0xf   : > { %v943_v51 = vsel (!%p274_p3), %vm397_vm0, %v1279_v45, 0  ;;  %v590_v1 = vsel (!%p274_p3), %vm397_vm0, %v1264_v60, 0  ;;  %v1281_v2 = vld [vmem:[%s1777_s3 + $0x24] sm:$0xf] (!%p274_p3)  ;;  %vm1113_vm6 = vcmask (!%p274_p3), 261120  }
  0x10   : > { %s1792_s22 = smov (!%p332_p5, %s1476_s22), 1  ;;  %s1796_s12 = smov (!%p356_p8, %s1288_s12), 17 }
  0x11   : > { %s335_s9 = scalar_select %p334_p6, %s1561_s28, 15 }
  0x12   : > { %s1249_s10 = sshll.u32 %s1792_s22, 4  ;;  %s1402_s19 = smul.u32 36, %s1792_s22 }
  0x13   : > { %s337_s11 = sadd.s32 %s1249_s10, %s335_s9  ;;  %s1794_s28 = smov (!%p344_p7, %s1561_s28), 17 }
  0x14   : > { %s1250_s13 = sshll.u32 %s337_s11, 3  ;;  %s1252_s20 = sshll.u32 %s1794_s28, 1 }
  0x15   : > { %s339_s18 = scalar_lea.vmem %s1774_s0, %s1250_s13  ;;  %s348_s29 = sadd.s32 %s1402_s19, %s1252_s20 }
  0x16   : > { %v1593_v6 = vld [vmem:[%s339_s18] sm:$0xff]  ;;  %v1596_v7 = vld [vmem:[%s339_s18 + $0x8] sm:$0xff]  ;;  %s1255_s30 = sshll.u32 %s1796_s12, 1  ;;  %s1253_s7 = sshll.u32 %s348_s29, 3 }
  0x17   : > { %v382_v8 = vsel %vm381_vm2, %v1593_v6, 0.0  ;;  %v736_v9 = vpack.c.bf16 %v1596_v7, %v1596_v7  ;;  %s350_s10 = scalar_lea.vmem %s1775_s1, %s1253_s7  ;;  %s360_s11 = sadd.s32 %s1402_s19, %s1255_s30  ;;  %v386_v17 = vmul.f32 %v1593_v6, %v1593_v6  ;;  %v380_v42 = vpack.c.bf16 %v1593_v6, %v1593_v6 }
  0x18   : > { %383 = vadd.xlane.f32.xlu1 %v382_v8  ;;  %v375_v11 = vld [vmem:[%s350_s10] sm:$0xff]  ;;  %v376_v12 = vld [vmem:[%s350_s10 + $0x8] sm:$0x1]  ;;  %s1256_s28 = sshll.u32 %s360_s11, 3  ;;  %v1624_v21 = vld [vmem:[%s350_s10 + $0x10] sm:$0xff]  ;;  %v788_v54 = vmul.f32 %v1596_v7, %v1596_v7  ;;  %v784_v57 = vsel %vm381_vm2, %v1596_v7, 0.0 }
  0x19   : > { %1342 = vmatmul.mubr.msk.bf16.vlgmr.msra.gmra.mrb[0].mxu0 %vm381_vm2, %v736_v9  ;;  %v554_v13 = vsel %vm553_vm3, %v375_v11, 0.0  ;;  %v487_v14 = vsel %vm381_vm2, %v375_v11, 0.0  ;;  %v569_v15 = vmul.f32 %v376_v12, %v376_v12  ;;  %v558_v16 = vsel %vm557_vm4, %v376_v12, 0.0  ;;  %s1622_s16 = scalar_lea.vmem %s1776_s2, %s1256_s28  ;;  %v1626_v23 = vld [vmem:[%s350_s10 + $0x18] sm:$0x1]  ;;  %s1798_s21 = smov (!%p367_p9, %s1472_s21), 7 }
  0x1a   : > { %1346 = vmatpush3.bf16.msra.mxu0 %v800_v10  ;;  %1347 = vmatprep.mubr.msk.bf16.mxu0 %vm1491_vm1, %v1490_v0  ;;  %v491_v18 = vmul.f32 %v375_v11, %v375_v11  ;;  %v393_v22 = vpack.c.bf16 %v375_v11, %v375_v11  ;;  %v387_v26 = vsel %vm381_vm2, %v386_v17, 0.0  ;;  %v854_v28 = vpack.c.bf16 %v1626_v23, %v1624_v21  ;;  %v1637_v29 = vld [vmem:[%s1622_s16] sm:$0xff]  ;;  %v1640_v30 = vld [vmem:[%s1622_s16 + $0x8] sm:$0x1]  ;;  %v1271_v62 = vld [vmem:[%s1622_s16 + $0x10] sm:$0xff]  ;;  %s1257_s14 = sshll.u32 %s1792_s22, 3 }
  0x1b   : > { %1351 = vmatprep.subr.bf16.mxu0 %v1490_v0  ;;  %555 = vadd.xlane.f32.xlu0 %v554_v13  ;;  %v573_v20 = vsel %vm557_vm4, %v569_v15, 0.0  ;;  %v795_v31 = vpack.c.bf16 %v1624_v21, %v1624_v21  ;;  %v702_v34 = vsel %vm557_vm4, %v1640_v30, 0.0  ;;  %v637_v35 = vmul.f32 %v1637_v29, %v1637_v29  ;;  %v1272_v63 = vld [vmem:[%s1622_s16 + $0x18] sm:$0x1]  ;;  %v1266_v17 = vld [vmem:[%s1777_s3 + $0x20] sm:$0xf]  ;;  %s370_s15 = sadd.s32 %s1257_s14, %s1798_s21 }
  0x1c   : > { %488 = vadd.xlane.f32.xlu1 %v487_v14  ;;  %v492_v27 = vsel %vm381_vm2, %v491_v18, 0.0  ;;  %1312 = vmatmul.mubr.msk.bf16.vlgmr.msra.gmra.mrb[0].mxu1 %vm381_vm2, %v393_v22  ;;  %v570_v33 = vsel %vm553_vm3, %v491_v18, 0.0  ;;  %v858_v36 = vshll.u32 %v854_v28, 16  ;;  %v699_v37 = vsel %vm553_vm3, %v1637_v29, 0.0  ;;  %s1258_s16 = sshll.u32 %s370_s15, 3 }
  0x1d   : > { %1316 = vmatpush3.bf16.msra.mxu1 %v445_v24  ;;  %1317 = vmatprep.mubr.msk.bf16.mxu1 %vm1491_vm1, %v1490_v0  ;;  %v713_v38 = vsel %vm553_vm3, %v637_v35, 0.0  ;;  %v856_v39 = vshrl.u32 %v854_v28, 16  ;;  %v498_v43 = vpack.c.bf16 %v376_v12, %v375_v11  ;;  %v633_v46 = vsel %vm381_vm2, %v1637_v29, 0.0  ;;  %s372_s29 = scalar_lea.vmem %s1780_s6, %s1258_s16 }
  0x1e   : > { %1321 = vmatprep.subr.bf16.mxu1 %v1490_v0  ;;  %v860_v40 = vrot.slane %v858_v36, 1  ;;  %v638_v47 = vsel %vm381_vm2, %v637_v35, 0.0  ;;  %v712_v48 = vmul.f32 %v1640_v30, %v1640_v30  ;;  %v909_v53 = vsel %vm553_vm3, %v1624_v21, 0.0 }
  0x1f   : > { %559 = vadd.xlane.f32.xlu0 %v558_v16  ;;  %v502_v50 = vshll.u32 %v498_v43, 16  ;;  %v500_v55 = vshrl.u32 %v498_v43, 16  ;;  %v789_v58 = vsel %vm381_vm2, %v788_v54, 0.0  ;;  %v847_v59 = vmul.f32 %v1624_v21, %v1624_v21 }
  0x20   : > { %574 = vadd.xlane.f32.xlu1 %v573_v20  ;;  %v861_v49 = vor.u32 %v860_v40, %v856_v39  ;;  %v716_v52 = vsel %vm557_vm4, %v712_v48, 0.0  ;;  %v912_v3 = vsel %vm557_vm4, %v1626_v23, 0.0  ;;  %v997_v5 = vpack.c.bf16 %v1272_v63, %v1271_v62 }
  0x21   : > { %v504_v56 = vrot.slane %v502_v50, 1  ;;  %v923_v4 = vsel %vm553_vm3, %v847_v59, 0.0  ;;  %v938_v6 = vpack.c.bf16 %v1271_v62, %v1271_v62  ;;  %v1009_v7 = vsel %vm397_vm0, %v1281_v2, 0 }
  0x22   : > { %v922_v8 = vmul.f32 %v1626_v23, %v1626_v23  ;;  %v843_v9 = vsel %vm381_vm2, %v1624_v21, 0.0  ;;  %v848_v10 = vsel %vm381_vm2, %v847_v59, 0.0  ;;  %v1001_v11 = vshll.u32 %v997_v5, 16 }
  0x23   : > { %388 = vadd.xlane.f32.xlu0 %v387_v26  ;;  %v505_v61 = vor.u32 %v504_v56, %v500_v55  ;;  %v999_v13 = vshrl.u32 %v997_v5, 16  ;;  %v1055_v15 = vsel %vm557_vm4, %v1272_v63, 0.0  ;;  %v990_v16 = vmul.f32 %v1271_v62, %v1271_v62 }
  0x24   : > { %493 = vadd.xlane.f32.xlu1 %v492_v27  ;;  %v926_v12 = vsel %vm557_vm4, %v922_v8, 0.0  ;;  %v1003_v14 = vrot.slane %v1001_v11, 1  ;;  %v644_v18 = vpack.c.bf16 %v1640_v30, %v1637_v29  ;;  %v585_v19 = vpack.c.bf16 %v1637_v29, %v1637_v29 }
  0x25   : > { %1348 = vmatmul.mubr.msk.bf16.vlgmr.msra.gmra.mrb[0].mxu0 %vm381_vm2, %v795_v31  ;;  %v656_v20 = vsel %vm397_vm0, %v1266_v17, 0  ;;  %v1052_v22 = vsel %vm553_vm3, %v1271_v62, 0.0  ;;  %v1066_v23 = vsel %vm553_vm3, %v990_v16, 0.0  ;;  %v986_v25 = vsel %vm381_vm2, %v1271_v62, 0.0 }
  0x26   : > { %1352 = vmatpush3.bf16.msra.mxu0 %v866_v32  ;;  %1353 = vmatprep.mubr.msk.bf16.mxu0 %vm1491_vm1, %v1490_v0  ;;  %v1004_v21 = vor.u32 %v1003_v14, %v999_v13  ;;  %v648_v24 = vshll.u32 %v644_v18, 16  ;;  %v991_v26 = vsel %vm381_vm2, %v990_v16, 0.0  ;;  %v1065_v27 = vmul.f32 %v1272_v63, %v1272_v63 }
  0x27   : > { %1357 = vmatprep.subr.bf16.mxu0 %v1490_v0  ;;  %571 = vadd.xlane.f32.xlu0 %v570_v33  ;;  %v646_v28 = vshrl.u32 %v644_v18, 16 }
  0x28   : > { %703 = vadd.xlane.f32.xlu1 %v702_v34  ;;  %1318 = vmatmul.mubr.msk.bf16.vlgmr.msra.gmra.mrb[0].mxu1 %vm381_vm2, %v380_v42  ;;  %v650_v29 = vrot.slane %v648_v24, 1  ;;  %v1069_v30 = vsel %vm557_vm4, %v1065_v27, 0.0 }
  0x29   : > { %1322 = vmatpush3.bf16.msra.mxu1 %v510_v44  ;;  %1323 = vmatprep.mubr.msk.bf16.mxu1 %vm1491_vm1, %v1490_v0 }
  0x2a   : > { %1327 = vmatprep.subr.bf16.mxu1 %v1490_v0  ;;  %v651_v31 = vor.u32 %v650_v29, %v646_v28 }
  0x2b   : > { %700 = vadd.xlane.f32.xlu0 %v699_v37 }
  0x2c   : > { %714 = vadd.xlane.f32.xlu1 %v713_v38 }
  0x2f   : > { %634 = vadd.xlane.f32.xlu0 %v633_v46 }
  0x30   : > { %639 = vadd.xlane.f32.xlu1 %v638_v47 }
  0x31   : > { %1354 = vmatmul.mubr.msk.bf16.vlgmr.msra.gmra.mrb[0].mxu0 %vm381_vm2, %v861_v49 }
  0x32   : > { %1358 = vmatpush3.bf16.msra.mxu0 %v943_v51  ;;  %1359 = vmatprep.mubr.msk.bf16.mxu0 %vm1491_vm1, %v1490_v0 }
  0x33   : > { %1363 = vmatprep.subr.bf16.mxu0 %v1490_v0  ;;  %717 = vadd.xlane.f32.xlu0 %v716_v52 }
  0x34   : > { %910 = vadd.xlane.f32.xlu1 %v909_v53  ;;  %1324 = vmatmul.mubr.msk.bf16.vlgmr.msra.gmra.mrb[0].mxu1 %vm381_vm2, %v505_v61 }
  0x35   : > { %1328 = vmatpush3.bf16.msra.mxu1 %v590_v1  ;;  %1329 = vmatprep.mubr.msk.bf16.mxu1 %vm1491_vm1, %v1490_v0 }
  0x36   : > { %1333 = vmatprep.subr.bf16.mxu1 %v1490_v0 }
  0x37   : > { %785 = vadd.xlane.f32.xlu0 %v784_v57 }
  0x38   : > { %790 = vadd.xlane.f32.xlu1 %v789_v58 }
  0x3b   : > { %913 = vadd.xlane.f32.xlu0 %v912_v3 }
  0x3c   : > { %924 = vadd.xlane.f32.xlu1 %v923_v4 }
  0x3d   : > { %1360 = vmatmul.mubr.msk.bf16.vlgmr.msra.gmra.mrb[0].mxu0 %vm381_vm2, %v938_v6 }
  0x3e   : > { %1364 = vmatpush3.bf16.msra.mxu0 %v1009_v7  ;;  %1365 = vmatprep.mubr.msk.bf16.mxu0 %vm1491_vm1, %v1490_v0 }
  0x3f   : > { %844 = vadd.xlane.f32.xlu0 %v843_v9 }
  0x40   : > { %849 = vadd.xlane.f32.xlu1 %v848_v10  ;;  %1330 = vmatmul.mubr.msk.bf16.vlgmr.msra.gmra.mrb[0].mxu1 %vm381_vm2, %v585_v19 }
  0x41   : > { %1334 = vmatpush3.bf16.msra.mxu1 %v656_v20  ;;  %1335 = vmatprep.mubr.msk.bf16.mxu1 %vm1491_vm1, %v1490_v0  ;;  %v1492_v0 = vmov 0  }
  0x42   : > { %1446 = vset.pattern.permute.xlu0 %v1492_v0  ;;  %1447 = vset.pattern.permute.xlu1 %v1492_v0 }
  0x43   : > { %927 = vadd.xlane.f32.xlu0 %v926_v12 }
  0x44   : > { %1056 = vadd.xlane.f32.xlu1 %v1055_v15 }
  0x47   : > { %1053 = vadd.xlane.f32.xlu0 %v1052_v22 }
  0x48   : > { %1067 = vadd.xlane.f32.xlu1 %v1066_v23 }
  0x49   : > { %1366 = vmatmul.mubr.msk.bf16.vlgmr.msra.gmra.mrb[0].mxu0 %vm381_vm2, %v1004_v21 }
  0x4b   : > { %987 = vadd.xlane.f32.xlu0 %v986_v25 }
  0x4c   : > { %992 = vadd.xlane.f32.xlu1 %v991_v26  ;;  %1336 = vmatmul.mubr.msk.bf16.vlgmr.msra.gmra.mrb[0].mxu1 %vm381_vm2, %v651_v31 }
  0x4f   : > { %1070 = vadd.xlane.f32.xlu0 %v1069_v30 }
  0xa5   : > { %v384_v32 = vpop.xlane.xlu1 %383 }
  0xa8   : > { %v556_v33 = vpop.xlane.xlu0 %555 }
  0xa9   : > { %v489_v34 = vpop.xlane.xlu1 %488  ;;  %v564_v48 = vrot.slane %v556_v33, 1 }
  0xaa   : > { %v490_v52 = vadd.f32 %v489_v34, %v384_v32 }
  0xac   : > { %v560_v35 = vpop.xlane.xlu0 %559 }
  0xad   : > { %v575_v36 = vpop.xlane.xlu1 %574  ;;  %v565_v47 = vrot.slane %v560_v35, 1 }
  0xae   : > { %v579_v62 = vrot.slane %v575_v36, 1 }
  0xaf   : > { %v566_v51 = vsel %vm563_vm5, %v564_v48, %v565_v47 }
  0xb0   : > { %v389_v37 = vpop.xlane.xlu0 %388  ;;  %v568_v55 = vadd.f32 %v566_v51, %v490_v52 }
  0xb1   : > { %v494_v38 = vpop.xlane.xlu1 %493 }
  0xb2   : > { %v495_v4 = vadd.f32 %v494_v38, %v389_v37 }
  0xb4   : > { %v572_v39 = vpop.xlane.xlu0 %571 }
  0xb5   : > { %v704_v40 = vpop.xlane.xlu1 %703  ;;  %v578_v58 = vrot.slane %v572_v39, 1 }
  0xb6   : > { %v708_v56 = vrot.slane %v704_v40, 1 }
  0xb7   : > { %v580_v1 = vsel %vm563_vm5, %v578_v58, %v579_v62 }
  0xb8   : > { %v701_v41 = vpop.xlane.xlu0 %700  ;;  %v582_v9 = vadd.f32 %v580_v1, %v495_v4 }
  0xb9   : > { %v715_v42 = vpop.xlane.xlu1 %714  ;;  %v707_v57 = vrot.slane %v701_v41, 1 }
  0xba   : > { %v721_v7 = vrot.slane %v715_v42, 1 }
  0xbb   : > { %v709_v63 = vsel %vm563_vm5, %v707_v57, %v708_v56  ;;  %v1284_v57 = vld [vmem:[%s1779_s5] ss:$0 sm:$0xff] }
  0xbc   : > { %v635_v43 = vpop.xlane.xlu0 %634 }
  0xbd   : > { %v640_v44 = vpop.xlane.xlu1 %639  ;;  %v636_v59 = vadd.f32 %v635_v43, %v568_v55 }
  0xbe   : > { %v641_v13 = vadd.f32 %v640_v44, %v582_v9 }
  0xbf   : > { %v711_v3 = vadd.f32 %v709_v63, %v636_v59 }
  0xc0   : > { %v718_v45 = vpop.xlane.xlu0 %717 }
  0xc1   : > { %v911_v46 = vpop.xlane.xlu1 %910  ;;  %v722_v2 = vrot.slane %v718_v45, 1 }
  0xc2   : > { %v917_v14 = vrot.slane %v911_v46, 1 }
  0xc3   : > { %v723_v11 = vsel %vm563_vm5, %v721_v7, %v722_v2 }
  0xc4   : > { %v786_v49 = vpop.xlane.xlu0 %785  ;;  %v725_v18 = vadd.f32 %v723_v11, %v641_v13 }
  0xc5   : > { %v791_v50 = vpop.xlane.xlu1 %790  ;;  %v787_v8 = vadd.f32 %v786_v49, %v711_v3 }
  0xc6   : > { %v792_v24 = vadd.f32 %v791_v50, %v725_v18 }
  0xc8   : > { %v914_v53 = vpop.xlane.xlu0 %913 }
  0xc9   : > { %v925_v54 = vpop.xlane.xlu1 %924  ;;  %v918_v10 = vrot.slane %v914_v53, 1  ;;  %v1283_v53 = vld [vmem:[%s1778_s4] ss:$0 sm:$0xff] }
  0xca   : > { %v931_v22 = vrot.slane %v925_v54, 1 }
  0xcb   : > { %v919_v21 = vsel %vm563_vm5, %v917_v14, %v918_v10 }
  0xcc   : > { %v845_v60 = vpop.xlane.xlu0 %844 }
  0xcd   : > { %v850_v61 = vpop.xlane.xlu1 %849  ;;  %v846_v12 = vadd.f32 %v845_v60, %v787_v8 }
  0xce   : > { %v851_v28 = vadd.f32 %v850_v61, %v792_v24 }
  0xcf   : > { %v921_v23 = vadd.f32 %v919_v21, %v846_v12 }
  0xd0   : > { %v928_v5 = vpop.xlane.xlu0 %927 }
  0xd1   : > { %v1057_v6 = vpop.xlane.xlu1 %1056  ;;  %v932_v16 = vrot.slane %v928_v5, 1 }
  0xd2   : > { %v1061_v19 = vrot.slane %v1057_v6, 1 }
  0xd3   : > { %v933_v27 = vsel %vm563_vm5, %v931_v22, %v932_v16 }
  0xd4   : > { %v1054_v15 = vpop.xlane.xlu0 %1053  ;;  %v935_v0 = vadd.f32 %v933_v27, %v851_v28 }
  0xd5   : > { %v1068_v17 = vpop.xlane.xlu1 %1067  ;;  %v1060_v20 = vrot.slane %v1054_v15, 1 }
  0xd6   : > { %v1074_v33 = vrot.slane %v1068_v17, 1 }
  0xd7   : > { %v1062_v29 = vsel %vm563_vm5, %v1060_v20, %v1061_v19 }
  0xd8   : > { %v988_v25 = vpop.xlane.xlu0 %987 }
  0xd9   : > { %v989_v26 = vadd.f32 %v988_v25, %v921_v23  ;;  %v993_v31 = vpop.xlane.xlu1 %992 }
  0xda   : > { %v994_v36 = vadd.f32 %v993_v31, %v935_v0 }
  0xdb   : > { %v1064_v30 = vadd.f32 %v1062_v29, %v989_v26 }
  0xdc   : > { %v1071_v32 = vpop.xlane.xlu0 %1070 }
  0xdd   : > { %v1079_v34 = vmul.f32 0.0125, %v1064_v30  ;;  %v1075_v35 = vrot.slane %v1071_v32, 1 }
  0xdf   : > { %v1076_v37 = vsel %vm563_vm5, %v1074_v33, %v1075_v35  ;;  %1088 = vperm.xlu0 %1446, %v1079_v34   ;;  %v1081_v39 = vmul.f32 %v1079_v34, %v1079_v34 }
  0xe0   : > { %v1078_v38 = vadd.f32 %v1076_v37, %v994_v36 }
  0xe2   : > { %v1080_v40 = vmul.f32 0.0125, %v1078_v38 }
  0xe4   : > { %v1082_v41 = vsub.f32 %v1080_v40, %v1081_v39 }
  0xe6   : > { %v1083_v42 = vadd.f32 1e-05, %v1082_v41 }
  0xe8   : > { %1448 = vrsqrt.f32 %v1083_v42 }
  0xf2   : > { %v1449_v43 = vpop.eup %1448 }
  0xf3   : > { %1101 = vperm.xlu1 %1447, %v1449_v43  }
 0x11c   : > { %v1045_v44 = vpop.f32.mrb[0].mxu0 }
 0x11d   : > { %v1367_v45 = vpop.f32.mrb[1].mxu0 }
 0x11e   : > { %v1048_v46 = vpop.f32.mrb[2].mxu0 }
 0x11f   : > { %v1368_v47 = vpop.f32.mrb[3].mxu0  ;;  %v692_v48 = vpop.f32.mrb[0].mxu1 }
 0x120   : > { %v1369_v49 = vadd.f32 %v1045_v44, %v692_v48  ;;  %v1337_v50 = vpop.f32.mrb[1].mxu1 }
 0x121   : > { %v695_v51 = vpop.f32.mrb[2].mxu1 }
 0x122   : > { %v1338_v52 = vpop.f32.mrb[3].mxu1 }
 0x15e   : > { %v1089_v54 = vpop.permute.xlu0 %1088 }
 0x15f   : > { %v1097_v55 = vmul.f32 %v1283_v53, %v1089_v54 }
 0x161   : > { %v1098_v56 = vsub.f32 %v1369_v49, %v1097_v55 }
 0x172   : > { %v1102_v58 = vpop.permute.xlu1 %1101 }
 0x173   : > { %v1104_v59 = vmul.f32 %v1102_v58, %v1098_v56 }
 0x175   : > { %v1112_v60 = vadd.f32 %v1284_v57, %v1104_v59 }
 0x177   : > { %1114 = vst.msk [vmem:[%s372_s29] sm:$0xff] %vm1113_vm6, %v1112_v60 }
 0x178 PF: > { %s16_s25 = sadd.s32 1, %s1488_s25   ;;  %s1781_s21 = smov %s1480_s23 }
 0x179   : > { %p13_p10 = scmp.ge.s32.totalorder %s16_s25, 18   ;;  %s1782_s22 = smov %s1484_s24 }
 0x17a   : > { %s1783_s23 = smov %s1786_s26  ;;  %s1784_s24 = smov %s1790_s27 }
 0x17b   :  { %15 = sbr.rel (!%p13_p10) target bundleno = 3 (0x3), region = 92 }

</bundles_post_ra>
